<compile_context>
chip_gen: v7x
topology: tpu7x:2x2x1
jax: 0.10.0
libtpu: 0.0.40
codegen_flags: <defaults>
</compile_context>

<pallas_src>
import jax
import jax.numpy as jnp
from jax.experimental import pallas as pl
from jax.experimental.pallas import tpu as pltpu

_LANE = 128
_NEG_BIG = -1e30  # bias fill for padded experts: exp(logit - m) underflows to 0
_MAX_TB = 16384   # VMEM guardrail: ~ (16K*32*4)*2 + small out bufs << 32 MiB scoped VMEM (v7x-safe)


def gate_kernel(x_ref, wt_ref, b_ref, o_ref):
    # Linear: [TB, D] @ [D, Ep] + [1, Ep] -> logits [TB, Ep] (f32 MXU accumulation).
    logits = jnp.dot(x_ref[...], wt_ref[...],
                     preferred_element_type=jnp.float32) + b_ref[...].astype(jnp.float32)
    # Numerically-stable softmax over the (lane-padded) expert axis == PyTorch dim=1.
    # Padded experts have bias -1e30 so exp() underflows to exactly 0.
    m = jnp.max(logits, axis=-1, keepdims=True)
    e = jnp.exp(logits - m)
    denom = jnp.sum(e, axis=-1, keepdims=True)
    probs = e / denom                      # exact normalize (hidden under the DMA pipeline)
    n_out = o_ref.shape[-1]
    # Store only the real expert columns -> HBM write is (TB, E), not (TB, 128).
    o_ref[...] = probs[:, :n_out].astype(o_ref.dtype)


def prepare_gate_params(w, b):
    """One-time parameter repack (do this at init, not per forward call).

    w: [E, D] (PyTorch nn.Linear layout), b: [E]
    returns wt_pad: [D, E_pad], b_pad: [1, E_pad] with E_pad a multiple of 128.
    Padded expert columns get zero weights and a very negative bias so their
    softmax probability is exactly 0 and the real-expert softmax is unchanged.
    """
    E, D = w.shape
    e_pad = max(_LANE, pl.cdiv(E, _LANE) * _LANE)
    wt_pad = jnp.zeros((D, e_pad), w.dtype).at[:, :E].set(w.T)
    b_pad = jnp.full((1, e_pad), _NEG_BIG, dtype=b.dtype).at[0, :E].set(b)
    return wt_pad, b_pad


def _pick_batch_tile(B, batch_tile):
    """Sublane-aligned batch tile; >=2 grid steps when possible (v7x megacore)."""
    tb = min(batch_tile, _MAX_TB, B)
    if B >= 16:
        # cap at ceil(B/2) rounded up to a multiple of 8 -> at least 2 parallel steps
        half = ((pl.cdiv(B, 2) + 7) // 8) * 8
        tb = min(tb, half)
    if tb != B:
        tb = max(8, (tb // 8) * 8)   # keep the sublane (8,·) tiling constraint
    return tb


def gate_forward(x, wt_pad, b_pad, output_size, *, batch_tile=4096):
    """x: [B, input_size]; wt_pad/b_pad from prepare_gate_params; returns [B, output_size]."""
    B, D = x.shape
    e_pad = wt_pad.shape[1]
    tb = _pick_batch_tile(B, batch_tile)
    grid = (pl.cdiv(B, tb),)
    return pl.pallas_call(
        gate_kernel,
        out_shape=jax.ShapeDtypeStruct((B, output_size), x.dtype),
        grid_spec=pltpu.PrefetchScalarGridSpec(
            num_scalar_prefetch=0,
            grid=grid,
            in_specs=[
                pl.BlockSpec((tb, D), lambda i: (i, 0)),      # batch-tiled activations
                pl.BlockSpec((D, e_pad), lambda i: (0, 0)),   # weight pinned across grid
                pl.BlockSpec((1, e_pad), lambda i: (0, 0)),   # bias pinned across grid
            ],
            # Narrow (TB, E) output block: last dim equals the full array dim -> legal,
            # and the kernel writes only the useful bytes (no padded writeback, no slice pass).
            out_specs=pl.BlockSpec((tb, output_size), lambda i: (i, 0)),
        ),
        compiler_params=pltpu.CompilerParams(
            dimension_semantics=("parallel",)),               # megacore sharding on v7x
    )(x, wt_pad, b_pad)


if __name__ == "__main__":
    # Small shapes consistent with the module: batch=8, input_size=32, output_size=4 experts.
    B, D, E = 8, 32, 4
    key = jax.random.PRNGKey(0)
    kx, kw, kb = jax.random.split(key, 3)

    x = jax.random.normal(kx, (B, D), dtype=jnp.float32)
    # Deterministic init mimicking nn.Linear default: U(-1/sqrt(D), 1/sqrt(D))
    bound = 1.0 / (D ** 0.5)
    w = jax.random.uniform(kw, (E, D), jnp.float32, minval=-bound, maxval=bound)
    b = jax.random.uniform(kb, (E,), jnp.float32, minval=-bound, maxval=bound)

    # One-time repack of the PyTorch-layout parameters (transpose + lane padding).
    wt_pad, b_pad = prepare_gate_params(w, b)

    fwd = jax.jit(gate_forward, static_argnums=(3,))

    out = jax.block_until_ready(fwd(x, wt_pad, b_pad, E))
    ref = jax.nn.softmax(x @ w.T + b, axis=1)
    assert out.shape == (B, E)
    # exact divide in the normalize -> tight tolerance
    assert jnp.allclose(out, ref, atol=1e-6, rtol=1e-6)
    assert jnp.allclose(jnp.sum(out, axis=1), 1.0, atol=1e-6)

    # Exercise the multi-block / parallel-grid path (>=2 grid steps, incl. a ragged tail).
    B2 = 1000
    x2 = jax.random.normal(jax.random.PRNGKey(1), (B2, D), dtype=jnp.float32)
    out2 = jax.block_until_ready(fwd(x2, wt_pad, b_pad, E))
    ref2 = jax.nn.softmax(x2 @ w.T + b, axis=1)
    assert out2.shape == (B2, E)
    assert jnp.allclose(out2, ref2, atol=1e-6, rtol=1e-6)

    # bf16 activations (halves HBM traffic in a bandwidth-bound kernel); math stays f32.
    x3 = x2.astype(jnp.bfloat16)
    out3 = jax.block_until_ready(fwd(x3, wt_pad, b_pad, E))
    assert out3.dtype == jnp.bfloat16 and out3.shape == (B2, E)
    assert jnp.allclose(out3.astype(jnp.float32), ref2, atol=2e-2, rtol=2e-2)

    print("KERNEL_OK")
</pallas_src>

<mosaic_0001>
module attributes {stable_mosaic.version = 11 : i64} {
  func.func @gate_kernel(%arg0: i32, %arg1: memref<8x32xf32, #tpu.memory_space<vmem>>, %arg2: memref<32x128xf32, #tpu.memory_space<vmem>>, %arg3: memref<1x128xf32, #tpu.memory_space<vmem>>, %arg4: memref<8x4xf32, #tpu.memory_space<vmem>>) attributes {dimension_semantics = [#tpu.dimension_semantics<parallel>], iteration_bounds = array<i64: 1>, scalar_prefetch = 0 : i64, scratch_operands = 0 : i64, tpu.core_type = #tpu.core_type<tc>, window_params = [{transform_indices = @transform_0, window_bounds = array<i64: 8, 32>}, {pipeline_mode = #tpu.pipeline_mode<synchronous>, transform_indices = @transform_1, window_bounds = array<i64: 32, 128>}, {pipeline_mode = #tpu.pipeline_mode<synchronous>, transform_indices = @transform_2, window_bounds = array<i64: 1, 128>}, {transform_indices = @transform_3, window_bounds = array<i64: 8, 4>}]} {
    %c0 = arith.constant 0 : index
    %c0_0 = arith.constant 0 : index
    %0 = vector.load %arg1[%c0, %c0_0] : memref<8x32xf32, #tpu.memory_space<vmem>>, vector<8x32xf32>
    %c0_1 = arith.constant 0 : index
    %c0_2 = arith.constant 0 : index
    %1 = vector.load %arg2[%c0_1, %c0_2] : memref<32x128xf32, #tpu.memory_space<vmem>>, vector<32x128xf32>
    %cst = arith.constant dense<0.000000e+00> : vector<8x128xf32>
    %2 = tpu.matmul %0, %1, %cst {dimension_numbers = #tpu.dot_dimension_numbers<[1], [0], [0], [1], [0, 0, 1, 1], [], []>} : vector<8x32xf32>, vector<32x128xf32>, vector<8x128xf32> -> vector<8x128xf32>
    %c0_3 = arith.constant 0 : index
    %c0_4 = arith.constant 0 : index
    %3 = vector.load %arg3[%c0_3, %c0_4] : memref<1x128xf32, #tpu.memory_space<vmem>>, vector<1x128xf32>
    %4 = vector.broadcast %3 : vector<1x128xf32> to vector<8x128xf32>
    %5 = arith.addf %2, %4 : vector<8x128xf32>
    %cst_5 = arith.constant dense<0xFF800000> : vector<8xf32>
    %6 = vector.multi_reduction <maximumf>, %5, %cst_5 [1] : vector<8x128xf32> to vector<8xf32>
    %7 = vector.shape_cast %6 : vector<8xf32> to vector<8x1xf32>
    %8 = vector.broadcast %7 : vector<8x1xf32> to vector<8x128xf32>
    %9 = arith.subf %5, %8 : vector<8x128xf32>
    %10 = math.exp %9 : vector<8x128xf32>
    %cst_6 = arith.constant dense<0.000000e+00> : vector<8xf32>
    %11 = vector.multi_reduction <add>, %10, %cst_6 [1] : vector<8x128xf32> to vector<8xf32>
    %12 = vector.shape_cast %11 : vector<8xf32> to vector<8x1xf32>
    %13 = vector.broadcast %12 : vector<8x1xf32> to vector<8x128xf32>
    %14 = arith.divf %10, %13 : vector<8x128xf32>
    %15 = vector.extract_strided_slice %14 {offsets = [0, 0], sizes = [8, 4], strides = [1, 1]} : vector<8x128xf32> to vector<8x4xf32>
    %c0_7 = arith.constant 0 : index
    %c0_8 = arith.constant 0 : index
    %16 = vector.load %arg4[%c0_7, %c0_8] : memref<8x4xf32, #tpu.memory_space<vmem>>, vector<8x4xf32>
    tpu.vector_store %arg4[%c0_7, %c0_8], %15 {strides = array<i32>} : memref<8x4xf32, #tpu.memory_space<vmem>>, vector<8x4xf32>,
    return
  }
  func.func @transform_0(%arg0: i32) -> (i32, i32) {
    %c0_i32 = arith.constant 0 : i32
    %c0_i32_0 = arith.constant 0 : i32
    return %arg0, %c0_i32 : i32, i32
  }
  func.func @transform_1(%arg0: i32) -> (i32, i32) {
    %c0_i32 = arith.constant 0 : i32
    %c0_i32_0 = arith.constant 0 : i32
    %c0_i32_1 = arith.constant 0 : i32
    return %c0_i32, %c0_i32_0 : i32, i32
  }
  func.func @transform_2(%arg0: i32) -> (i32, i32) {
    %c0_i32 = arith.constant 0 : i32
    %c0_i32_0 = arith.constant 0 : i32
    %c0_i32_1 = arith.constant 0 : i32
    return %c0_i32, %c0_i32_0 : i32, i32
  }
  func.func @transform_3(%arg0: i32) -> (i32, i32) {
    %c0_i32 = arith.constant 0 : i32
    %c0_i32_0 = arith.constant 0 : i32
    return %arg0, %c0_i32 : i32, i32
  }
}

</mosaic_0001>

<bundles_post_ra>
// kernel: gate_forward.1
= control target key start
LH: loop header
LB: loop body
LE: loop exit
PB: predicated region body
PF: predicated region fallthrough
CT: control target
= control target key end

     0   :  { %8 = vsyncpa [#allocation3], 0  ;;  %s290_s0 = inlined_call_operand.hbm [shape: f32[8,32], index: 0, kind: input, shape index: {}]   ;;  %s291_s1 = inlined_call_operand.hbm [shape: f32[32,128], index: 1, kind: input, shape index: {}]   ;;  %s292_s2 = inlined_call_operand.vmem [shape: f32[1,128], index: 2, kind: input, shape index: {}]   ;;  %s293_s3 = inlined_call_operand.vmem [shape: f32[8,4], index: 3, kind: output, shape index: {}]  }
   0x1   :  { %9 = vsyncpa [#allocation5], 0  ;;  %s226_s12 = smov [#allocation2]   ;;  %s227_s14 = smov [#allocation4]  }
   0x2   :  { %s16_s13 = sshll.u32 %s226_s12, 4  ;;  %s25_s15 = sshll.u32 %s227_s14, 4  ;;  %s17_s13 = int_to_ptr.vmem [resolvable:$true] %s16_s13  ;;  %s253_s15 = int_to_ptr.vmem [resolvable:$true] %s25_s15 }
   0x3   :  { %s178_s18 = scalar_lea.hbm %s290_s0, 128 }
   0x4   :  { %p179_p0 = scmp.ne.s32.totalorder %s290_s0, %s178_s18  ;;  %p182_p1 = scmp.lt.u32.totalorder %s178_s18, %s290_s0 }
   0x6   :  { %p184_p2 = pnand %p182_p1, %p179_p0 }
   0x8   :  { %187 = shalt.err (!%p184_p2)
}
   0x9   :  { %s188_s23 = scalar_lea.vmem %s17_s13, 128  ;;  %p193_p4 = scmp.lt.s32.totalorder %s17_s13, %s17_s13 }
   0xa   :  { %p189_p3 = scmp.ne.s32.totalorder %s17_s13, %s188_s23  ;;  %p194_p5 = scmp.lt.s32.totalorder %s188_s23, %s188_s23 }
   0xc   :  { %p195_p6 = por %p194_p5, %p193_p4 }
   0xe   :  { %p196_p7 = pnand %p195_p6, %p189_p3 }
  0x10   :  { %199 = shalt.err (!%p196_p7)
}
  0x11   :  { %19 = dma.hbm_to_vmem [thread:$0]  %s290_s0, 128, %s17_s13, [#allocation3]  }
  0x12   :  { %s200_s28 = scalar_lea.hbm %s291_s1, 512 }
  0x13   :  { %p201_p8 = scmp.ne.s32.totalorder %s291_s1, %s200_s28  ;;  %p204_p9 = scmp.lt.u32.totalorder %s200_s28, %s291_s1 }
  0x15   :  { %p206_p10 = pnand %p204_p9, %p201_p8 }
  0x17   :  { %209 = shalt.err (!%p206_p10)
}
  0x18   :  { %s210_s6 = scalar_lea.vmem %s253_s15, 512  ;;  %p215_p12 = scmp.lt.s32.totalorder %s253_s15, %s253_s15 }
  0x19   :  { %p211_p11 = scmp.ne.s32.totalorder %s253_s15, %s210_s6  ;;  %p216_p13 = scmp.lt.s32.totalorder %s210_s6, %s210_s6 }
  0x1b   :  { %p217_p0 = por %p216_p13, %p215_p12 }
  0x1d   :  { %p218_p1 = pnand %p217_p0, %p211_p11 }
  0x1f   :  { %221 = shalt.err (!%p218_p1)
}
  0x20   :  { %s228_s0 = smov 128   ;;  %s229_s7 = smov 8  }
  0x21   :  { %31 = dma.hbm_to_vmem [thread:$0]  %s291_s1, 512, %s253_s15, [#allocation5], %s228_s0, %s228_s0, %s229_s7  }
  0x22   :  { %222 = dma.done.wait [#allocation3], 128  }
  0x23   :  { %223 = vsyncadd [#allocation3], 4294967168 }
  0x24   :  { %224 = dma.done.wait [#allocation5], 512  }
  0x25   :  { %225 = vsyncadd [#allocation5], 4294966784  ;;  %v230_v0 = vmov 0.0|0.0   ;;  %vm231_vm0 = vmmov 0   ;;  %v232_v1 = vmov 0.0   ;;  %v41_v2 = vld [vmem:[#allocation4] sm:$0xff] }
  0x26   :  { %161 = vmatprep.subr.bf16.mxu0 %v230_v0  ;;  %158 = vmatprep.mubr.msk.f32.mxu0 %vm231_vm0, %v232_v1  ;;  %v42_v3 = vld [vmem:[#allocation4 + $0x8] sm:$0xff]  ;;  %v43_v4 = vld [vmem:[#allocation4 + $0x10] sm:$0xff]  ;;  %v44_v6 = vld [vmem:[#allocation4 + $0x18] sm:$0xff]  ;;  %vm52_vm1 = vcmask 261120   ;;  %vm135_vm2 = vcmask 31744  }
  0x27   :  { %v162_v5 = vpack.c.bf16 %v42_v3, %v41_v2  ;;  %v165_v7 = vpack.c.bf16 %v44_v6, %v43_v4  ;;  %v40_v8 = vld [vmem:[#allocation2] sm:$0xff]  ;;  %v143_v9 = vld [vmem:[%s292_s2] ss:$0 sm:$0xff] }
  0x29   :  { %163 = vmatpush3.bf16.msra.mxu0 %v162_v5 }
  0x2a   :  { %164 = vmatprep.subr.bf16.mxu0 %v230_v0 }
  0x2d   :  { %166 = vmatpush3.bf16.msra.mxu0 %v165_v7 }
  0x30   :  { %159 = vmatmul.mubr.msk.f32.vlgmr.msra.gmra.mrb[0].mxu0 %vm52_vm1, %v40_v8 }
 0x103   :  { %v122_v10 = vpop.f32.mrb[0].mxu0 }
 0x104   :  { %v123_v11 = vadd.f32 %v143_v9, %v122_v10  ;;  %v160_v12 = vpop.f32.mrb[1].mxu0 }
 0x106   :  { %126 = vmax.xlane.f32.xlu0 %v123_v11 }
 0x193   :  { %v127_v13 = vpop.xlane.xlu0 %126 }
 0x194   :  { %v128_v14 = vsub.f32 %v123_v11, %v127_v13 }
 0x196   :  { %v129_v15 = vmul.f32 1.442695, %v128_v14 }
 0x198   :  { %174 = vpow2.f32 %v129_v15 }
 0x1a2   :  { %v175_v16 = vpop.eup %174 }
 0x1a3   :  { %131 = vadd.xlane.f32.xlu0 %v175_v16 }
 0x230   :  { %v132_v17 = vpop.xlane.xlu0 %131 }
 0x231   :  { %176 = vrcp.f32 %v132_v17 }
 0x23b   :  { %v177_v18 = vpop.eup %176 }
 0x23c   :  { %v134_v19 = vmul.f32 %v177_v18, %v175_v16 }
 0x23e   :  { %136 = vst.msk [vmem:[%s293_s3] sm:$0xff] %vm135_vm2, %v134_v19 }
 0x23f   :  { %141 = vsyncpa [#allocation3], 1 }
 0x240   :  { %142 = vsyncpa [#allocation5], 1 }

</bundles_post_ra>
